<compile_context>
chip_gen: v5e
topology: v5e:2x2
jax: 0.10.0
libtpu: 0.0.40
codegen_flags: <defaults>
</compile_context>

<pallas_src>
import functools

import jax
import jax.numpy as jnp
from jax.experimental import pallas as pl
from jax.experimental.pallas import tpu as pltpu


def _round_up(x, m):
    return ((x + m - 1) // m) * m


def _cnn_kernel(x_ref, w_ref, b_ref, o_ref, *, L_out, K):
    """One grid step == one batch block of TB words.

    x_ref : (L, TB, C)      raw time-major / channels-last activations (VMEM)
    w_ref : (K, C, F_pad)   per-tap matmul-ready conv weights (VMEM, resident)
    b_ref : (1, F_pad)      bias (VMEM, resident)
    o_ref : (TB, F_pad)     maxpooled output block (VMEM, lane-dense)
    """
    L = x_ref.shape[0]

    # Hoist every time slab / weight tap load once (all static leading-dim
    # indices -> cheap views of the already-resident VMEM block).
    xs = [x_ref[j] for j in range(L)]        # each (TB, C)
    ws = [w_ref[k] for k in range(K)]        # each (C, F_pad)

    def conv_t(t):
        # In-kernel im2col as K shifted matmuls accumulated in f32 on the MXU.
        acc = jnp.dot(xs[t], ws[0], preferred_element_type=jnp.float32)
        for k in range(1, K):
            acc = acc + jnp.dot(xs[t + k], ws[k],
                                preferred_element_type=jnp.float32)
        return acc                            # (TB, F_pad) f32

    # MaxPool over time folded into the t-loop: live set stays ~(TB, F_pad).
    m = conv_t(0)
    for t in range(1, L_out):
        m = jnp.maximum(m, conv_t(t))

    # Bias + ReLU hoisted past the max (exactly equivalent: ReLU monotone,
    # bias constant per output column).
    o_ref[...] = jnp.maximum(m + b_ref[...], 0.0).astype(o_ref.dtype)


def cnn_forward(x, w, b, *, tb_max=256, use_bf16=False):
    """x: (B, C, L) f32, w: (F, C, K) f32, b: (F,) f32 -> (B, F) f32."""
    B, C, L = x.shape
    F_, C_w, K = w.shape
    assert C == C_w
    L_out = L - K + 1
    assert L_out >= 1

    tb_max = max(8, (tb_max // 8) * 8)
    B8 = _round_up(max(B, 1), 8)
    # Balance the batch blocks: bound tail padding to ~8 rows/block and force
    # >= 2 grid steps when there is enough batch (v7x megacore utilization).
    nb = max(pl.cdiv(B8, tb_max), 2 if B8 >= 16 else 1)
    TB = _round_up(pl.cdiv(B8, nb), 8)
    nb = pl.cdiv(B8, TB)
    B_pad = nb * TB
    F_pad = _round_up(F_, 128)               # lane-dense output columns

    # Raw-size layout change only (no im2col expansion in HBM):
    # x_t[l, b, c] = x[b, c, l]
    x_t = jnp.transpose(x, (2, 0, 1))        # (L, B, C)
    if B_pad != B:
        x_t = jnp.pad(x_t, ((0, 0), (0, B_pad - B), (0, 0)))

    # Per-tap matmul-ready weights: w_mat[k, c, f] = w[f, c, k]; pad F -> F_pad.
    w_mat = jnp.transpose(w, (2, 1, 0))      # (K, C, F)
    if F_pad != F_:
        w_mat = jnp.pad(w_mat, ((0, 0), (0, 0), (0, F_pad - F_)))
    b_mat = jnp.pad(b, (0, F_pad - F_)).reshape(1, F_pad)

    if use_bf16:
        # Opt-in: bf16 MXU feed path (accumulation stays f32). Breaks exact
        # f32 parity with the reference, so it is off by default.
        x_t = x_t.astype(jnp.bfloat16)
        w_mat = w_mat.astype(jnp.bfloat16)

    kernel = functools.partial(_cnn_kernel, L_out=L_out, K=K)

    out = pl.pallas_call(
        kernel,
        out_shape=jax.ShapeDtypeStruct((B_pad, F_pad), jnp.float32),
        grid=(nb,),
        in_specs=[
            # per-step raw batch slab (time-major, channels-last)
            pl.BlockSpec((L, TB, C), lambda i: (0, i, 0)),
            # full per-tap weights, same block every step (stays resident)
            pl.BlockSpec((K, C, F_pad), lambda i: (0, 0, 0)),
            # full bias
            pl.BlockSpec((1, F_pad), lambda i: (0, 0)),
        ],
        out_specs=pl.BlockSpec((TB, F_pad), lambda i: (i, 0)),
        compiler_params=pltpu.CompilerParams(
            dimension_semantics=("parallel",)
        ),
    )(x_t, w_mat, b_mat)

    # Strip batch-tail padding and F lane padding.
    return out[:B, :F_]


def cnn_reference(x, w, b):
    """Pure-JAX reference mirroring the PyTorch forward exactly."""
    B, C, L = x.shape
    F_, _, K = w.shape
    L_out = L - K + 1
    patches = jnp.stack([x[:, :, t:t + K] for t in range(L_out)], axis=-1)  # (B, C, K, L_out)
    conv = jnp.einsum("fck,bckt->bft", w, patches) + b[None, :, None]
    relu = jax.nn.relu(conv)
    return jnp.max(relu, axis=-1)   # maxpool over full valid window + squeeze(-1)


if __name__ == "__main__":
    # Small shapes consistent with the module:
    #   batch (= batch*sentence_len flattened in the assignment) = 2
    #   char_embed_size = 8, max_word_length = 16, num_filters = 32, kernel_size = 5
    B, C, L = 2, 8, 16
    F_, K = 32, 5

    key = jax.random.PRNGKey(0)
    kx, kw, kb = jax.random.split(key, 3)
    x = jax.random.normal(kx, (B, C, L), dtype=jnp.float32)
    w = jax.random.normal(kw, (F_, C, K), dtype=jnp.float32) * 0.1
    b = jax.random.normal(kb, (F_,), dtype=jnp.float32) * 0.1

    out = jax.block_until_ready(cnn_forward(x, w, b))
    ref = cnn_reference(x, w, b)
    assert out.shape == (B, F_), out.shape
    assert jnp.allclose(out, ref, atol=1e-5, rtol=1e-5), "mismatch vs reference"

    # Multi-block grid + batch-tail (B % TB != 0) path with a tiny block size.
    B2 = 20
    x2 = jax.random.normal(jax.random.PRNGKey(1), (B2, C, L), dtype=jnp.float32)
    out2 = jax.block_until_ready(cnn_forward(x2, w, b, tb_max=8))
    ref2 = cnn_reference(x2, w, b)
    assert out2.shape == (B2, F_), out2.shape
    assert jnp.allclose(out2, ref2, atol=1e-5, rtol=1e-5), "mismatch vs reference (blocked)"

    # Default tb_max path: block balancing forces >=2 grid steps for megacore.
    B3 = 40
    x3 = jax.random.normal(jax.random.PRNGKey(2), (B3, C, L), dtype=jnp.float32)
    out3 = jax.block_until_ready(cnn_forward(x3, w, b))
    ref3 = cnn_reference(x3, w, b)
    assert out3.shape == (B3, F_), out3.shape
    assert jnp.allclose(out3, ref3, atol=1e-5, rtol=1e-5), "mismatch vs reference (balanced)"

    print("KERNEL_OK")
</pallas_src>

<mosaic_0001>
module attributes {stable_mosaic.version = 11 : i64} {
  func.func @_cnn_kernel(%arg0: i32, %arg1: memref<16x8x8xf32, #tpu.memory_space<vmem>>, %arg2: memref<5x8x128xf32, #tpu.memory_space<vmem>>, %arg3: memref<1x128xf32, #tpu.memory_space<vmem>>, %arg4: memref<8x128xf32, #tpu.memory_space<vmem>>) attributes {dimension_semantics = [#tpu.dimension_semantics<parallel>], iteration_bounds = array<i64: 1>, scalar_prefetch = 0 : i64, scratch_operands = 0 : i64, tpu.core_type = #tpu.core_type<tc>, window_params = [{transform_indices = @transform_0, window_bounds = array<i64: 16, 8, 8>}, {pipeline_mode = #tpu.pipeline_mode<synchronous>, transform_indices = @transform_1, window_bounds = array<i64: 5, 8, 128>}, {pipeline_mode = #tpu.pipeline_mode<synchronous>, transform_indices = @transform_2, window_bounds = array<i64: 1, 128>}, {transform_indices = @transform_3, window_bounds = array<i64: 8, 128>}]} {
    %c0 = arith.constant 0 : index
    %c0_0 = arith.constant 0 : index
    %c0_1 = arith.constant 0 : index
    %0 = vector.load %arg1[%c0, %c0_0, %c0_1] : memref<16x8x8xf32, #tpu.memory_space<vmem>>, vector<1x8x8xf32>
    %1 = vector.shape_cast %0 : vector<1x8x8xf32> to vector<8x8xf32>
    %c1 = arith.constant 1 : index
    %c0_2 = arith.constant 0 : index
    %c0_3 = arith.constant 0 : index
    %2 = vector.load %arg1[%c1, %c0_2, %c0_3] : memref<16x8x8xf32, #tpu.memory_space<vmem>>, vector<1x8x8xf32>
    %3 = vector.shape_cast %2 : vector<1x8x8xf32> to vector<8x8xf32>
    %c2 = arith.constant 2 : index
    %c0_4 = arith.constant 0 : index
    %c0_5 = arith.constant 0 : index
    %4 = vector.load %arg1[%c2, %c0_4, %c0_5] : memref<16x8x8xf32, #tpu.memory_space<vmem>>, vector<1x8x8xf32>
    %5 = vector.shape_cast %4 : vector<1x8x8xf32> to vector<8x8xf32>
    %c3 = arith.constant 3 : index
    %c0_6 = arith.constant 0 : index
    %c0_7 = arith.constant 0 : index
    %6 = vector.load %arg1[%c3, %c0_6, %c0_7] : memref<16x8x8xf32, #tpu.memory_space<vmem>>, vector<1x8x8xf32>
    %7 = vector.shape_cast %6 : vector<1x8x8xf32> to vector<8x8xf32>
    %c4 = arith.constant 4 : index
    %c0_8 = arith.constant 0 : index
    %c0_9 = arith.constant 0 : index
    %8 = vector.load %arg1[%c4, %c0_8, %c0_9] : memref<16x8x8xf32, #tpu.memory_space<vmem>>, vector<1x8x8xf32>
    %9 = vector.shape_cast %8 : vector<1x8x8xf32> to vector<8x8xf32>
    %c5 = arith.constant 5 : index
    %c0_10 = arith.constant 0 : index
    %c0_11 = arith.constant 0 : index
    %10 = vector.load %arg1[%c5, %c0_10, %c0_11] : memref<16x8x8xf32, #tpu.memory_space<vmem>>, vector<1x8x8xf32>
    %11 = vector.shape_cast %10 : vector<1x8x8xf32> to vector<8x8xf32>
    %c6 = arith.constant 6 : index
    %c0_12 = arith.constant 0 : index
    %c0_13 = arith.constant 0 : index
    %12 = vector.load %arg1[%c6, %c0_12, %c0_13] : memref<16x8x8xf32, #tpu.memory_space<vmem>>, vector<1x8x8xf32>
    %13 = vector.shape_cast %12 : vector<1x8x8xf32> to vector<8x8xf32>
    %c7 = arith.constant 7 : index
    %c0_14 = arith.constant 0 : index
    %c0_15 = arith.constant 0 : index
    %14 = vector.load %arg1[%c7, %c0_14, %c0_15] : memref<16x8x8xf32, #tpu.memory_space<vmem>>, vector<1x8x8xf32>
    %15 = vector.shape_cast %14 : vector<1x8x8xf32> to vector<8x8xf32>
    %c8 = arith.constant 8 : index
    %c0_16 = arith.constant 0 : index
    %c0_17 = arith.constant 0 : index
    %16 = vector.load %arg1[%c8, %c0_16, %c0_17] : memref<16x8x8xf32, #tpu.memory_space<vmem>>, vector<1x8x8xf32>
    %17 = vector.shape_cast %16 : vector<1x8x8xf32> to vector<8x8xf32>
    %c9 = arith.constant 9 : index
    %c0_18 = arith.constant 0 : index
    %c0_19 = arith.constant 0 : index
    %18 = vector.load %arg1[%c9, %c0_18, %c0_19] : memref<16x8x8xf32, #tpu.memory_space<vmem>>, vector<1x8x8xf32>
    %19 = vector.shape_cast %18 : vector<1x8x8xf32> to vector<8x8xf32>
    %c10 = arith.constant 10 : index
    %c0_20 = arith.constant 0 : index
    %c0_21 = arith.constant 0 : index
    %20 = vector.load %arg1[%c10, %c0_20, %c0_21] : memref<16x8x8xf32, #tpu.memory_space<vmem>>, vector<1x8x8xf32>
    %21 = vector.shape_cast %20 : vector<1x8x8xf32> to vector<8x8xf32>
    %c11 = arith.constant 11 : index
    %c0_22 = arith.constant 0 : index
    %c0_23 = arith.constant 0 : index
    %22 = vector.load %arg1[%c11, %c0_22, %c0_23] : memref<16x8x8xf32, #tpu.memory_space<vmem>>, vector<1x8x8xf32>
    %23 = vector.shape_cast %22 : vector<1x8x8xf32> to vector<8x8xf32>
    %c12 = arith.constant 12 : index
    %c0_24 = arith.constant 0 : index
    %c0_25 = arith.constant 0 : index
    %24 = vector.load %arg1[%c12, %c0_24, %c0_25] : memref<16x8x8xf32, #tpu.memory_space<vmem>>, vector<1x8x8xf32>
    %25 = vector.shape_cast %24 : vector<1x8x8xf32> to vector<8x8xf32>
    %c13 = arith.constant 13 : index
    %c0_26 = arith.constant 0 : index
    %c0_27 = arith.constant 0 : index
    %26 = vector.load %arg1[%c13, %c0_26, %c0_27] : memref<16x8x8xf32, #tpu.memory_space<vmem>>, vector<1x8x8xf32>
    %27 = vector.shape_cast %26 : vector<1x8x8xf32> to vector<8x8xf32>
    %c14 = arith.constant 14 : index
    %c0_28 = arith.constant 0 : index
    %c0_29 = arith.constant 0 : index
    %28 = vector.load %arg1[%c14, %c0_28, %c0_29] : memref<16x8x8xf32, #tpu.memory_space<vmem>>, vector<1x8x8xf32>
    %29 = vector.shape_cast %28 : vector<1x8x8xf32> to vector<8x8xf32>
    %c15 = arith.constant 15 : index
    %c0_30 = arith.constant 0 : index
    %c0_31 = arith.constant 0 : index
    %30 = vector.load %arg1[%c15, %c0_30, %c0_31] : memref<16x8x8xf32, #tpu.memory_space<vmem>>, vector<1x8x8xf32>
    %31 = vector.shape_cast %30 : vector<1x8x8xf32> to vector<8x8xf32>
    %c0_32 = arith.constant 0 : index
    %c0_33 = arith.constant 0 : index
    %c0_34 = arith.constant 0 : index
    %32 = vector.load %arg2[%c0_32, %c0_33, %c0_34] : memref<5x8x128xf32, #tpu.memory_space<vmem>>, vector<1x8x128xf32>
    %33 = vector.shape_cast %32 : vector<1x8x128xf32> to vector<8x128xf32>
    %c1_35 = arith.constant 1 : index
    %c0_36 = arith.constant 0 : index
    %c0_37 = arith.constant 0 : index
    %34 = vector.load %arg2[%c1_35, %c0_36, %c0_37] : memref<5x8x128xf32, #tpu.memory_space<vmem>>, vector<1x8x128xf32>
    %35 = vector.shape_cast %34 : vector<1x8x128xf32> to vector<8x128xf32>
    %c2_38 = arith.constant 2 : index
    %c0_39 = arith.constant 0 : index
    %c0_40 = arith.constant 0 : index
    %36 = vector.load %arg2[%c2_38, %c0_39, %c0_40] : memref<5x8x128xf32, #tpu.memory_space<vmem>>, vector<1x8x128xf32>
    %37 = vector.shape_cast %36 : vector<1x8x128xf32> to vector<8x128xf32>
    %c3_41 = arith.constant 3 : index
    %c0_42 = arith.constant 0 : index
    %c0_43 = arith.constant 0 : index
    %38 = vector.load %arg2[%c3_41, %c0_42, %c0_43] : memref<5x8x128xf32, #tpu.memory_space<vmem>>, vector<1x8x128xf32>
    %39 = vector.shape_cast %38 : vector<1x8x128xf32> to vector<8x128xf32>
    %c4_44 = arith.constant 4 : index
    %c0_45 = arith.constant 0 : index
    %c0_46 = arith.constant 0 : index
    %40 = vector.load %arg2[%c4_44, %c0_45, %c0_46] : memref<5x8x128xf32, #tpu.memory_space<vmem>>, vector<1x8x128xf32>
    %41 = vector.shape_cast %40 : vector<1x8x128xf32> to vector<8x128xf32>
    %cst = arith.constant dense<0.000000e+00> : vector<8x128xf32>
    %42 = tpu.matmul %1, %33, %cst {dimension_numbers = #tpu.dot_dimension_numbers<[1], [0], [0], [1], [0, 0, 1, 1], [], []>} : vector<8x8xf32>, vector<8x128xf32>, vector<8x128xf32> -> vector<8x128xf32>
    %cst_47 = arith.constant dense<0.000000e+00> : vector<8x128xf32>
    %43 = tpu.matmul %3, %35, %cst_47 {dimension_numbers = #tpu.dot_dimension_numbers<[1], [0], [0], [1], [0, 0, 1, 1], [], []>} : vector<8x8xf32>, vector<8x128xf32>, vector<8x128xf32> -> vector<8x128xf32>
    %44 = arith.addf %42, %43 : vector<8x128xf32>
    %cst_48 = arith.constant dense<0.000000e+00> : vector<8x128xf32>
    %45 = tpu.matmul %5, %37, %cst_48 {dimension_numbers = #tpu.dot_dimension_numbers<[1], [0], [0], [1], [0, 0, 1, 1], [], []>} : vector<8x8xf32>, vector<8x128xf32>, vector<8x128xf32> -> vector<8x128xf32>
    %46 = arith.addf %44, %45 : vector<8x128xf32>
    %cst_49 = arith.constant dense<0.000000e+00> : vector<8x128xf32>
    %47 = tpu.matmul %7, %39, %cst_49 {dimension_numbers = #tpu.dot_dimension_numbers<[1], [0], [0], [1], [0, 0, 1, 1], [], []>} : vector<8x8xf32>, vector<8x128xf32>, vector<8x128xf32> -> vector<8x128xf32>
    %48 = arith.addf %46, %47 : vector<8x128xf32>
    %cst_50 = arith.constant dense<0.000000e+00> : vector<8x128xf32>
    %49 = tpu.matmul %9, %41, %cst_50 {dimension_numbers = #tpu.dot_dimension_numbers<[1], [0], [0], [1], [0, 0, 1, 1], [], []>} : vector<8x8xf32>, vector<8x128xf32>, vector<8x128xf32> -> vector<8x128xf32>
    %50 = arith.addf %48, %49 : vector<8x128xf32>
    %cst_51 = arith.constant dense<0.000000e+00> : vector<8x128xf32>
    %51 = tpu.matmul %3, %33, %cst_51 {dimension_numbers = #tpu.dot_dimension_numbers<[1], [0], [0], [1], [0, 0, 1, 1], [], []>} : vector<8x8xf32>, vector<8x128xf32>, vector<8x128xf32> -> vector<8x128xf32>
    %cst_52 = arith.constant dense<0.000000e+00> : vector<8x128xf32>
    %52 = tpu.matmul %5, %35, %cst_52 {dimension_numbers = #tpu.dot_dimension_numbers<[1], [0], [0], [1], [0, 0, 1, 1], [], []>} : vector<8x8xf32>, vector<8x128xf32>, vector<8x128xf32> -> vector<8x128xf32>
    %53 = arith.addf %51, %52 : vector<8x128xf32>
    %cst_53 = arith.constant dense<0.000000e+00> : vector<8x128xf32>
    %54 = tpu.matmul %7, %37, %cst_53 {dimension_numbers = #tpu.dot_dimension_numbers<[1], [0], [0], [1], [0, 0, 1, 1], [], []>} : vector<8x8xf32>, vector<8x128xf32>, vector<8x128xf32> -> vector<8x128xf32>
    %55 = arith.addf %53, %54 : vector<8x128xf32>
    %cst_54 = arith.constant dense<0.000000e+00> : vector<8x128xf32>
    %56 = tpu.matmul %9, %39, %cst_54 {dimension_numbers = #tpu.dot_dimension_numbers<[1], [0], [0], [1], [0, 0, 1, 1], [], []>} : vector<8x8xf32>, vector<8x128xf32>, vector<8x128xf32> -> vector<8x128xf32>
    %57 = arith.addf %55, %56 : vector<8x128xf32>
    %cst_55 = arith.constant dense<0.000000e+00> : vector<8x128xf32>
    %58 = tpu.matmul %11, %41, %cst_55 {dimension_numbers = #tpu.dot_dimension_numbers<[1], [0], [0], [1], [0, 0, 1, 1], [], []>} : vector<8x8xf32>, vector<8x128xf32>, vector<8x128xf32> -> vector<8x128xf32>
    %59 = arith.addf %57, %58 : vector<8x128xf32>
    %60 = arith.maximumf %50, %59 : vector<8x128xf32>
    %cst_56 = arith.constant dense<0.000000e+00> : vector<8x128xf32>
    %61 = tpu.matmul %5, %33, %cst_56 {dimension_numbers = #tpu.dot_dimension_numbers<[1], [0], [0], [1], [0, 0, 1, 1], [], []>} : vector<8x8xf32>, vector<8x128xf32>, vector<8x128xf32> -> vector<8x128xf32>
    %cst_57 = arith.constant dense<0.000000e+00> : vector<8x128xf32>
    %62 = tpu.matmul %7, %35, %cst_57 {dimension_numbers = #tpu.dot_dimension_numbers<[1], [0], [0], [1], [0, 0, 1, 1], [], []>} : vector<8x8xf32>, vector<8x128xf32>, vector<8x128xf32> -> vector<8x128xf32>
    %63 = arith.addf %61, %62 : vector<8x128xf32>
    %cst_58 = arith.constant dense<0.000000e+00> : vector<8x128xf32>
    %64 = tpu.matmul %9, %37, %cst_58 {dimension_numbers = #tpu.dot_dimension_numbers<[1], [0], [0], [1], [0, 0, 1, 1], [], []>} : vector<8x8xf32>, vector<8x128xf32>, vector<8x128xf32> -> vector<8x128xf32>
    %65 = arith.addf %63, %64 : vector<8x128xf32>
    %cst_59 = arith.constant dense<0.000000e+00> : vector<8x128xf32>
    %66 = tpu.matmul %11, %39, %cst_59 {dimension_numbers = #tpu.dot_dimension_numbers<[1], [0], [0], [1], [0, 0, 1, 1], [], []>} : vector<8x8xf32>, vector<8x128xf32>, vector<8x128xf32> -> vector<8x128xf32>
    %67 = arith.addf %65, %66 : vector<8x128xf32>
    %cst_60 = arith.constant dense<0.000000e+00> : vector<8x128xf32>
    %68 = tpu.matmul %13, %41, %cst_60 {dimension_numbers = #tpu.dot_dimension_numbers<[1], [0], [0], [1], [0, 0, 1, 1], [], []>} : vector<8x8xf32>, vector<8x128xf32>, vector<8x128xf32> -> vector<8x128xf32>
    %69 = arith.addf %67, %68 : vector<8x128xf32>
    %70 = arith.maximumf %60, %69 : vector<8x128xf32>
    %cst_61 = arith.constant dense<0.000000e+00> : vector<8x128xf32>
    %71 = tpu.matmul %7, %33, %cst_61 {dimension_numbers = #tpu.dot_dimension_numbers<[1], [0], [0], [1], [0, 0, 1, 1], [], []>} : vector<8x8xf32>, vector<8x128xf32>, vector<8x128xf32> -> vector<8x128xf32>
    %cst_62 = arith.constant dense<0.000000e+00> : vector<8x128xf32>
    %72 = tpu.matmul %9, %35, %cst_62 {dimension_numbers = #tpu.dot_dimension_numbers<[1], [0], [0], [1], [0, 0, 1, 1], [], []>} : vector<8x8xf32>, vector<8x128xf32>, vector<8x128xf32> -> vector<8x128xf32>
    %73 = arith.addf %71, %72 : vector<8x128xf32>
    %cst_63 = arith.constant dense<0.000000e+00> : vector<8x128xf32>
    %74 = tpu.matmul %11, %37, %cst_63 {dimension_numbers = #tpu.dot_dimension_numbers<[1], [0], [0], [1], [0, 0, 1, 1], [], []>} : vector<8x8xf32>, vector<8x128xf32>, vector<8x128xf32> -> vector<8x128xf32>
    %75 = arith.addf %73, %74 : vector<8x128xf32>
    %cst_64 = arith.constant dense<0.000000e+00> : vector<8x128xf32>
    %76 = tpu.matmul %13, %39, %cst_64 {dimension_numbers = #tpu.dot_dimension_numbers<[1], [0], [0], [1], [0, 0, 1, 1], [], []>} : vector<8x8xf32>, vector<8x128xf32>, vector<8x128xf32> -> vector<8x128xf32>
    %77 = arith.addf %75, %76 : vector<8x128xf32>
    %cst_65 = arith.constant dense<0.000000e+00> : vector<8x128xf32>
    %78 = tpu.matmul %15, %41, %cst_65 {dimension_numbers = #tpu.dot_dimension_numbers<[1], [0], [0], [1], [0, 0, 1, 1], [], []>} : vector<8x8xf32>, vector<8x128xf32>, vector<8x128xf32> -> vector<8x128xf32>
    %79 = arith.addf %77, %78 : vector<8x128xf32>
    %80 = arith.maximumf %70, %79 : vector<8x128xf32>
    %cst_66 = arith.constant dense<0.000000e+00> : vector<8x128xf32>
    %81 = tpu.matmul %9, %33, %cst_66 {dimension_numbers = #tpu.dot_dimension_numbers<[1], [0], [0], [1], [0, 0, 1, 1], [], []>} : vector<8x8xf32>, vector<8x128xf32>, vector<8x128xf32> -> vector<8x128xf32>
    %cst_67 = arith.constant dense<0.000000e+00> : vector<8x128xf32>
    %82 = tpu.matmul %11, %35, %cst_67 {dimension_numbers = #tpu.dot_dimension_numbers<[1], [0], [0], [1], [0, 0, 1, 1], [], []>} : vector<8x8xf32>, vector<8x128xf32>, vector<8x128xf32> -> vector<8x128xf32>
    %83 = arith.addf %81, %82 : vector<8x128xf32>
    %cst_68 = arith.constant dense<0.000000e+00> : vector<8x128xf32>
    %84 = tpu.matmul %13, %37, %cst_68 {dimension_numbers = #tpu.dot_dimension_numbers<[1], [0], [0], [1], [0, 0, 1, 1], [], []>} : vector<8x8xf32>, vector<8x128xf32>, vector<8x128xf32> -> vector<8x128xf32>
    %85 = arith.addf %83, %84 : vector<8x128xf32>
    %cst_69 = arith.constant dense<0.000000e+00> : vector<8x128xf32>
    %86 = tpu.matmul %15, %39, %cst_69 {dimension_numbers = #tpu.dot_dimension_numbers<[1], [0], [0], [1], [0, 0, 1, 1], [], []>} : vector<8x8xf32>, vector<8x128xf32>, vector<8x128xf32> -> vector<8x128xf32>
    %87 = arith.addf %85, %86 : vector<8x128xf32>
    %cst_70 = arith.constant dense<0.000000e+00> : vector<8x128xf32>
    %88 = tpu.matmul %17, %41, %cst_70 {dimension_numbers = #tpu.dot_dimension_numbers<[1], [0], [0], [1], [0, 0, 1, 1], [], []>} : vector<8x8xf32>, vector<8x128xf32>, vector<8x128xf32> -> vector<8x128xf32>
    %89 = arith.addf %87, %88 : vector<8x128xf32>
    %90 = arith.maximumf %80, %89 : vector<8x128xf32>
    %cst_71 = arith.constant dense<0.000000e+00> : vector<8x128xf32>
    %91 = tpu.matmul %11, %33, %cst_71 {dimension_numbers = #tpu.dot_dimension_numbers<[1], [0], [0], [1], [0, 0, 1, 1], [], []>} : vector<8x8xf32>, vector<8x128xf32>, vector<8x128xf32> -> vector<8x128xf32>
    %cst_72 = arith.constant dense<0.000000e+00> : vector<8x128xf32>
    %92 = tpu.matmul %13, %35, %cst_72 {dimension_numbers = #tpu.dot_dimension_numbers<[1], [0], [0], [1], [0, 0, 1, 1], [], []>} : vector<8x8xf32>, vector<8x128xf32>, vector<8x128xf32> -> vector<8x128xf32>
    %93 = arith.addf %91, %92 : vector<8x128xf32>
    %cst_73 = arith.constant dense<0.000000e+00> : vector<8x128xf32>
    %94 = tpu.matmul %15, %37, %cst_73 {dimension_numbers = #tpu.dot_dimension_numbers<[1], [0], [0], [1], [0, 0, 1, 1], [], []>} : vector<8x8xf32>, vector<8x128xf32>, vector<8x128xf32> -> vector<8x128xf32>
    %95 = arith.addf %93, %94 : vector<8x128xf32>
    %cst_74 = arith.constant dense<0.000000e+00> : vector<8x128xf32>
    %96 = tpu.matmul %17, %39, %cst_74 {dimension_numbers = #tpu.dot_dimension_numbers<[1], [0], [0], [1], [0, 0, 1, 1], [], []>} : vector<8x8xf32>, vector<8x128xf32>, vector<8x128xf32> -> vector<8x128xf32>
    %97 = arith.addf %95, %96 : vector<8x128xf32>
    %cst_75 = arith.constant dense<0.000000e+00> : vector<8x128xf32>
    %98 = tpu.matmul %19, %41, %cst_75 {dimension_numbers = #tpu.dot_dimension_numbers<[1], [0], [0], [1], [0, 0, 1, 1], [], []>} : vector<8x8xf32>, vector<8x128xf32>, vector<8x128xf32> -> vector<8x128xf32>
    %99 = arith.addf %97, %98 : vector<8x128xf32>
    %100 = arith.maximumf %90, %99 : vector<8x128xf32>
    %cst_76 = arith.constant dense<0.000000e+00> : vector<8x128xf32>
    %101 = tpu.matmul %13, %33, %cst_76 {dimension_numbers = #tpu.dot_dimension_numbers<[1], [0], [0], [1], [0, 0, 1, 1], [], []>} : vector<8x8xf32>, vector<8x128xf32>, vector<8x128xf32> -> vector<8x128xf32>
    %cst_77 = arith.constant dense<0.000000e+00> : vector<8x128xf32>
    %102 = tpu.matmul %15, %35, %cst_77 {dimension_numbers = #tpu.dot_dimension_numbers<[1], [0], [0], [1], [0, 0, 1, 1], [], []>} : vector<8x8xf32>, vector<8x128xf32>, vector<8x128xf32> -> vector<8x128xf32>
    %103 = arith.addf %101, %102 : vector<8x128xf32>
    %cst_78 = arith.constant dense<0.000000e+00> : vector<8x128xf32>
    %104 = tpu.matmul %17, %37, %cst_78 {dimension_numbers = #tpu.dot_dimension_numbers<[1], [0], [0], [1], [0, 0, 1, 1], [], []>} : vector<8x8xf32>, vector<8x128xf32>, vector<8x128xf32> -> vector<8x128xf32>
    %105 = arith.addf %103, %104 : vector<8x128xf32>
    %cst_79 = arith.constant dense<0.000000e+00> : vector<8x128xf32>
    %106 = tpu.matmul %19, %39, %cst_79 {dimension_numbers = #tpu.dot_dimension_numbers<[1], [0], [0], [1], [0, 0, 1, 1], [], []>} : vector<8x8xf32>, vector<8x128xf32>, vector<8x128xf32> -> vector<8x128xf32>
    %107 = arith.addf %105, %106 : vector<8x128xf32>
    %cst_80 = arith.constant dense<0.000000e+00> : vector<8x128xf32>
    %108 = tpu.matmul %21, %41, %cst_80 {dimension_numbers = #tpu.dot_dimension_numbers<[1], [0], [0], [1], [0, 0, 1, 1], [], []>} : vector<8x8xf32>, vector<8x128xf32>, vector<8x128xf32> -> vector<8x128xf32>
    %109 = arith.addf %107, %108 : vector<8x128xf32>
    %110 = arith.maximumf %100, %109 : vector<8x128xf32>
    %cst_81 = arith.constant dense<0.000000e+00> : vector<8x128xf32>
    %111 = tpu.matmul %15, %33, %cst_81 {dimension_numbers = #tpu.dot_dimension_numbers<[1], [0], [0], [1], [0, 0, 1, 1], [], []>} : vector<8x8xf32>, vector<8x128xf32>, vector<8x128xf32> -> vector<8x128xf32>
    %cst_82 = arith.constant dense<0.000000e+00> : vector<8x128xf32>
    %112 = tpu.matmul %17, %35, %cst_82 {dimension_numbers = #tpu.dot_dimension_numbers<[1], [0], [0], [1], [0, 0, 1, 1], [], []>} : vector<8x8xf32>, vector<8x128xf32>, vector<8x128xf32> -> vector<8x128xf32>
    %113 = arith.addf %111, %112 : vector<8x128xf32>
    %cst_83 = arith.constant dense<0.000000e+00> : vector<8x128xf32>
    %114 = tpu.matmul %19, %37, %cst_83 {dimension_numbers = #tpu.dot_dimension_numbers<[1], [0], [0], [1], [0, 0, 1, 1], [], []>} : vector<8x8xf32>, vector<8x128xf32>, vector<8x128xf32> -> vector<8x128xf32>
    %115 = arith.addf %113, %114 : vector<8x128xf32>
    %cst_84 = arith.constant dense<0.000000e+00> : vector<8x128xf32>
    %116 = tpu.matmul %21, %39, %cst_84 {dimension_numbers = #tpu.dot_dimension_numbers<[1], [0], [0], [1], [0, 0, 1, 1], [], []>} : vector<8x8xf32>, vector<8x128xf32>, vector<8x128xf32> -> vector<8x128xf32>
    %117 = arith.addf %115, %116 : vector<8x128xf32>
    %cst_85 = arith.constant dense<0.000000e+00> : vector<8x128xf32>
    %118 = tpu.matmul %23, %41, %cst_85 {dimension_numbers = #tpu.dot_dimension_numbers<[1], [0], [0], [1], [0, 0, 1, 1], [], []>} : vector<8x8xf32>, vector<8x128xf32>, vector<8x128xf32> -> vector<8x128xf32>
    %119 = arith.addf %117, %118 : vector<8x128xf32>
    %120 = arith.maximumf %110, %119 : vector<8x128xf32>
    %cst_86 = arith.constant dense<0.000000e+00> : vector<8x128xf32>
    %121 = tpu.matmul %17, %33, %cst_86 {dimension_numbers = #tpu.dot_dimension_numbers<[1], [0], [0], [1], [0, 0, 1, 1], [], []>} : vector<8x8xf32>, vector<8x128xf32>, vector<8x128xf32> -> vector<8x128xf32>
    %cst_87 = arith.constant dense<0.000000e+00> : vector<8x128xf32>
    %122 = tpu.matmul %19, %35, %cst_87 {dimension_numbers = #tpu.dot_dimension_numbers<[1], [0], [0], [1], [0, 0, 1, 1], [], []>} : vector<8x8xf32>, vector<8x128xf32>, vector<8x128xf32> -> vector<8x128xf32>
    %123 = arith.addf %121, %122 : vector<8x128xf32>
    %cst_88 = arith.constant dense<0.000000e+00> : vector<8x128xf32>
    %124 = tpu.matmul %21, %37, %cst_88 {dimension_numbers = #tpu.dot_dimension_numbers<[1], [0], [0], [1], [0, 0, 1, 1], [], []>} : vector<8x8xf32>, vector<8x128xf32>, vector<8x128xf32> -> vector<8x128xf32>
    %125 = arith.addf %123, %124 : vector<8x128xf32>
    %cst_89 = arith.constant dense<0.000000e+00> : vector<8x128xf32>
    %126 = tpu.matmul %23, %39, %cst_89 {dimension_numbers = #tpu.dot_dimension_numbers<[1], [0], [0], [1], [0, 0, 1, 1], [], []>} : vector<8x8xf32>, vector<8x128xf32>, vector<8x128xf32> -> vector<8x128xf32>
    %127 = arith.addf %125, %126 : vector<8x128xf32>
    %cst_90 = arith.constant dense<0.000000e+00> : vector<8x128xf32>
    %128 = tpu.matmul %25, %41, %cst_90 {dimension_numbers = #tpu.dot_dimension_numbers<[1], [0], [0], [1], [0, 0, 1, 1], [], []>} : vector<8x8xf32>, vector<8x128xf32>, vector<8x128xf32> -> vector<8x128xf32>
    %129 = arith.addf %127, %128 : vector<8x128xf32>
    %130 = arith.maximumf %120, %129 : vector<8x128xf32>
    %cst_91 = arith.constant dense<0.000000e+00> : vector<8x128xf32>
    %131 = tpu.matmul %19, %33, %cst_91 {dimension_numbers = #tpu.dot_dimension_numbers<[1], [0], [0], [1], [0, 0, 1, 1], [], []>} : vector<8x8xf32>, vector<8x128xf32>, vector<8x128xf32> -> vector<8x128xf32>
    %cst_92 = arith.constant dense<0.000000e+00> : vector<8x128xf32>
    %132 = tpu.matmul %21, %35, %cst_92 {dimension_numbers = #tpu.dot_dimension_numbers<[1], [0], [0], [1], [0, 0, 1, 1], [], []>} : vector<8x8xf32>, vector<8x128xf32>, vector<8x128xf32> -> vector<8x128xf32>
    %133 = arith.addf %131, %132 : vector<8x128xf32>
    %cst_93 = arith.constant dense<0.000000e+00> : vector<8x128xf32>
    %134 = tpu.matmul %23, %37, %cst_93 {dimension_numbers = #tpu.dot_dimension_numbers<[1], [0], [0], [1], [0, 0, 1, 1], [], []>} : vector<8x8xf32>, vector<8x128xf32>, vector<8x128xf32> -> vector<8x128xf32>
    %135 = arith.addf %133, %134 : vector<8x128xf32>
    %cst_94 = arith.constant dense<0.000000e+00> : vector<8x128xf32>
    %136 = tpu.matmul %25, %39, %cst_94 {dimension_numbers = #tpu.dot_dimension_numbers<[1], [0], [0], [1], [0, 0, 1, 1], [], []>} : vector<8x8xf32>, vector<8x128xf32>, vector<8x128xf32> -> vector<8x128xf32>
    %137 = arith.addf %135, %136 : vector<8x128xf32>
    %cst_95 = arith.constant dense<0.000000e+00> : vector<8x128xf32>
    %138 = tpu.matmul %27, %41, %cst_95 {dimension_numbers = #tpu.dot_dimension_numbers<[1], [0], [0], [1], [0, 0, 1, 1], [], []>} : vector<8x8xf32>, vector<8x128xf32>, vector<8x128xf32> -> vector<8x128xf32>
    %139 = arith.addf %137, %138 : vector<8x128xf32>
    %140 = arith.maximumf %130, %139 : vector<8x128xf32>
    %cst_96 = arith.constant dense<0.000000e+00> : vector<8x128xf32>
    %141 = tpu.matmul %21, %33, %cst_96 {dimension_numbers = #tpu.dot_dimension_numbers<[1], [0], [0], [1], [0, 0, 1, 1], [], []>} : vector<8x8xf32>, vector<8x128xf32>, vector<8x128xf32> -> vector<8x128xf32>
    %cst_97 = arith.constant dense<0.000000e+00> : vector<8x128xf32>
    %142 = tpu.matmul %23, %35, %cst_97 {dimension_numbers = #tpu.dot_dimension_numbers<[1], [0], [0], [1], [0, 0, 1, 1], [], []>} : vector<8x8xf32>, vector<8x128xf32>, vector<8x128xf32> -> vector<8x128xf32>
    %143 = arith.addf %141, %142 : vector<8x128xf32>
    %cst_98 = arith.constant dense<0.000000e+00> : vector<8x128xf32>
    %144 = tpu.matmul %25, %37, %cst_98 {dimension_numbers = #tpu.dot_dimension_numbers<[1], [0], [0], [1], [0, 0, 1, 1], [], []>} : vector<8x8xf32>, vector<8x128xf32>, vector<8x128xf32> -> vector<8x128xf32>
    %145 = arith.addf %143, %144 : vector<8x128xf32>
    %cst_99 = arith.constant dense<0.000000e+00> : vector<8x128xf32>
    %146 = tpu.matmul %27, %39, %cst_99 {dimension_numbers = #tpu.dot_dimension_numbers<[1], [0], [0], [1], [0, 0, 1, 1], [], []>} : vector<8x8xf32>, vector<8x128xf32>, vector<8x128xf32> -> vector<8x128xf32>
    %147 = arith.addf %145, %146 : vector<8x128xf32>
    %cst_100 = arith.constant dense<0.000000e+00> : vector<8x128xf32>
    %148 = tpu.matmul %29, %41, %cst_100 {dimension_numbers = #tpu.dot_dimension_numbers<[1], [0], [0], [1], [0, 0, 1, 1], [], []>} : vector<8x8xf32>, vector<8x128xf32>, vector<8x128xf32> -> vector<8x128xf32>
    %149 = arith.addf %147, %148 : vector<8x128xf32>
    %150 = arith.maximumf %140, %149 : vector<8x128xf32>
    %cst_101 = arith.constant dense<0.000000e+00> : vector<8x128xf32>
    %151 = tpu.matmul %23, %33, %cst_101 {dimension_numbers = #tpu.dot_dimension_numbers<[1], [0], [0], [1], [0, 0, 1, 1], [], []>} : vector<8x8xf32>, vector<8x128xf32>, vector<8x128xf32> -> vector<8x128xf32>
    %cst_102 = arith.constant dense<0.000000e+00> : vector<8x128xf32>
    %152 = tpu.matmul %25, %35, %cst_102 {dimension_numbers = #tpu.dot_dimension_numbers<[1], [0], [0], [1], [0, 0, 1, 1], [], []>} : vector<8x8xf32>, vector<8x128xf32>, vector<8x128xf32> -> vector<8x128xf32>
    %153 = arith.addf %151, %152 : vector<8x128xf32>
    %cst_103 = arith.constant dense<0.000000e+00> : vector<8x128xf32>
    %154 = tpu.matmul %27, %37, %cst_103 {dimension_numbers = #tpu.dot_dimension_numbers<[1], [0], [0], [1], [0, 0, 1, 1], [], []>} : vector<8x8xf32>, vector<8x128xf32>, vector<8x128xf32> -> vector<8x128xf32>
    %155 = arith.addf %153, %154 : vector<8x128xf32>
    %cst_104 = arith.constant dense<0.000000e+00> : vector<8x128xf32>
    %156 = tpu.matmul %29, %39, %cst_104 {dimension_numbers = #tpu.dot_dimension_numbers<[1], [0], [0], [1], [0, 0, 1, 1], [], []>} : vector<8x8xf32>, vector<8x128xf32>, vector<8x128xf32> -> vector<8x128xf32>
    %157 = arith.addf %155, %156 : vector<8x128xf32>
    %cst_105 = arith.constant dense<0.000000e+00> : vector<8x128xf32>
    %158 = tpu.matmul %31, %41, %cst_105 {dimension_numbers = #tpu.dot_dimension_numbers<[1], [0], [0], [1], [0, 0, 1, 1], [], []>} : vector<8x8xf32>, vector<8x128xf32>, vector<8x128xf32> -> vector<8x128xf32>
    %159 = arith.addf %157, %158 : vector<8x128xf32>
    %160 = arith.maximumf %150, %159 : vector<8x128xf32>
    %c0_106 = arith.constant 0 : index
    %c0_107 = arith.constant 0 : index
    %161 = vector.load %arg3[%c0_106, %c0_107] : memref<1x128xf32, #tpu.memory_space<vmem>>, vector<1x128xf32>
    %162 = vector.broadcast %161 : vector<1x128xf32> to vector<8x128xf32>
    %163 = arith.addf %160, %162 : vector<8x128xf32>
    %cst_108 = arith.constant 0.000000e+00 : f32
    %164 = vector.broadcast %cst_108 : f32 to vector<8x128xf32>
    %165 = arith.maximumf %163, %164 : vector<8x128xf32>
    %c0_109 = arith.constant 0 : index
    %c0_110 = arith.constant 0 : index
    %166 = vector.load %arg4[%c0_109, %c0_110] : memref<8x128xf32, #tpu.memory_space<vmem>>, vector<8x128xf32>
    tpu.vector_store %arg4[%c0_109, %c0_110], %165 {strides = array<i32>} : memref<8x128xf32, #tpu.memory_space<vmem>>, vector<8x128xf32>,
    return
  }
  func.func @transform_0(%arg0: i32) -> (i32, i32, i32) {
    %c0_i32 = arith.constant 0 : i32
    %c0_i32_0 = arith.constant 0 : i32
    %c0_i32_1 = arith.constant 0 : i32
    return %c0_i32, %arg0, %c0_i32_0 : i32, i32, i32
  }
  func.func @transform_1(%arg0: i32) -> (i32, i32, i32) {
    %c0_i32 = arith.constant 0 : i32
    %c0_i32_0 = arith.constant 0 : i32
    %c0_i32_1 = arith.constant 0 : i32
    %c0_i32_2 = arith.constant 0 : i32
    return %c0_i32, %c0_i32_0, %c0_i32_1 : i32, i32, i32
  }
  func.func @transform_2(%arg0: i32) -> (i32, i32) {
    %c0_i32 = arith.constant 0 : i32
    %c0_i32_0 = arith.constant 0 : i32
    %c0_i32_1 = arith.constant 0 : i32
    return %c0_i32, %c0_i32_0 : i32, i32
  }
  func.func @transform_3(%arg0: i32) -> (i32, i32) {
    %c0_i32 = arith.constant 0 : i32
    %c0_i32_0 = arith.constant 0 : i32
    return %arg0, %c0_i32 : i32, i32
  }
}

</mosaic_0001>

<bundles_post_ra>
// kernel: tpu_custom_call.1
= control target key start
LH: loop header
LB: loop body
LE: loop exit
PB: predicated region body
PF: predicated region fallthrough
CT: control target
= control target key end

     0   :  { %vm55_vm0 = vcmask 64512   ;;  %s1701_s0 = inlined_call_operand.vmem [shape: f32[16,8,8], index: 0, kind: input, shape index: {}]   ;;  %s1702_s1 = inlined_call_operand.vmem [shape: f32[5,8,128], index: 1, kind: input, shape index: {}]   ;;  %s1703_s2 = inlined_call_operand.vmem [shape: f32[1,128], index: 2, kind: input, shape index: {}]   ;;  %s1704_s3 = inlined_call_operand.hbm [shape: f32[8,128], index: 3, kind: output, shape index: {}]  }
   0x1   :  { %v1505_v0 = vld [vmem:[%s1702_s1 + $0x8] sm:$0xff]  ;;  %v1510_v1 = vld [vmem:[%s1702_s1 + $0x10] sm:$0xff]  ;;  %v1515_v2 = vld [vmem:[%s1702_s1 + $0x18] sm:$0xff] }
   0x2   :  { %74 = vmatpush.msra.mxu0 %v1505_v0  ;;  %120 = vmatpush.msra.mxu2 %v1510_v1  ;;  %v1374_v3 = vld [vmem:[%s1701_s0 + $0x8] sm:$0xff]  ;;  %v1375_v4 = vld [vmem:[%s1701_s0 + $0x10] sm:$0xff]  ;;  %v1376_v5 = vld [vmem:[%s1701_s0 + $0x18] sm:$0xff] }
   0x3   :  { %144 = vmatpush.msra.mxu3 %v1515_v2  ;;  %1393 = vmatmul.msk.f32.vlgmr.msra.gmra.mxu0 %vm55_vm0, %v1374_v3  ;;  %v1533_v6 = vld [vmem:[%s1702_s1] sm:$0xff] }
   0x4   :  { %v15_v7 = vld [vmem:[%s1701_s0] sm:$0xff]  ;;  %1395 = vmatmul.msk.f32.vlgmr.msra.gmra.mxu2 %vm55_vm0, %v1375_v4  ;;  %1396 = vmatmul.msk.f32.vlgmr.msra.gmra.mxu3 %vm55_vm0, %v1376_v5 }
   0x5   :  { %v1541_v8 = vld [vmem:[%s1702_s1 + $0x20] sm:$0xff]  ;;  %209 = vmatpush.msrb.mxu2 %v1533_v6  ;;  %97 = vmatpush.msra.mxu1 %v1533_v6 }
   0x6   :  { %8 = vsyncpa [#allocation3], 0  ;;  %1394 = vmatmul.msk.f32.vlgmr.msra.gmra.mxu1 %vm55_vm0, %v15_v7  ;;  %168 = vmatpush.msrb.mxu0 %v1541_v8  ;;  %v1377_v9 = vld [vmem:[%s1701_s0 + $0x20] sm:$0xff]  ;;  %v1378_v10 = vld [vmem:[%s1701_s0 + $0x28] sm:$0xff]  ;;  %s1481_s27 = smov [#allocation2]   ;;  %s1365_s1 = sshll.u32 %s1704_s3, 4  ;;  %s1366_s1 = int_to_ptr.hbm [resolvable:$true] %s1365_s1 }
   0x7   :  { %229 = vmatpush.msrb.mxu3 %v1510_v1  ;;  %189 = vmatpush.msrb.mxu1 %v1505_v0  ;;  %v1379_v11 = vld [vmem:[%s1701_s0 + $0x30] sm:$0xff]  ;;  %v1380_v12 = vld [vmem:[%s1701_s0 + $0x38] sm:$0xff]  ;;  %v1381_v13 = vld [vmem:[%s1701_s0 + $0x40] sm:$0xff]  ;;  %s1363_s28 = sshll.u32 %s1481_s27, 4  ;;  %s1364_s28 = int_to_ptr.vmem [resolvable:$true] %s1363_s28 }
   0x8   :  { %296 = vmatpush.msra.mxu2 %v1505_v0  ;;  %250 = vmatpush.msra.mxu0 %v1515_v2  ;;  %v1382_v14 = vld [vmem:[%s1701_s0 + $0x48] sm:$0xff]  ;;  %v1383_v15 = vld [vmem:[%s1701_s0 + $0x50] sm:$0xff]  ;;  %v1384_v16 = vld [vmem:[%s1701_s0 + $0x58] sm:$0xff] }
   0x9   :  { %316 = vmatpush.msra.mxu3 %v1533_v6  ;;  %274 = vmatpush.msra.mxu1 %v1541_v8  ;;  %v1385_v17 = vld [vmem:[%s1701_s0 + $0x60] sm:$0xff]  ;;  %v1386_v18 = vld [vmem:[%s1701_s0 + $0x68] sm:$0xff]  ;;  %v1387_v19 = vld [vmem:[%s1701_s0 + $0x70] sm:$0xff] }
   0xa   :  { %v1388_v20 = vld [vmem:[%s1701_s0 + $0x78] sm:$0xff] }
   0xb   :  { %1397 = vmatmul.msk.f32.vlgmr.msrb.gmra.mxu0 %vm55_vm0, %v1377_v9 }
   0xc   :  { %1399 = vmatmul.msk.f32.vlgmr.msrb.gmra.mxu2 %vm55_vm0, %v1374_v3  ;;  %1400 = vmatmul.msk.f32.vlgmr.msrb.gmra.mxu3 %vm55_vm0, %v1376_v5 }
   0xd   :  { %381 = vmatpush.msrb.mxu2 %v1541_v8  ;;  %336 = vmatpush.msrb.mxu0 %v1510_v1 }
   0xe   :  { %1398 = vmatmul.msk.f32.vlgmr.msrb.gmra.mxu1 %vm55_vm0, %v1375_v4  ;;  %403 = vmatpush.msrb.mxu3 %v1505_v0 }
   0xf   :  { %357 = vmatpush.msrb.mxu1 %v1515_v2 }
  0x13   :  { %1401 = vmatmul.msk.f32.vlgmr.msra.gmra.mxu0 %vm55_vm0, %v1377_v9 }
  0x14   :  { %1403 = vmatmul.msk.f32.vlgmr.msra.gmra.mxu2 %vm55_vm0, %v1376_v5  ;;  %1404 = vmatmul.msk.f32.vlgmr.msra.gmra.mxu3 %vm55_vm0, %v1375_v4 }
  0x15   :  { %464 = vmatpush.msra.mxu2 %v1515_v2  ;;  %423 = vmatpush.msra.mxu0 %v1533_v6 }
  0x16   :  { %1402 = vmatmul.msk.f32.vlgmr.msra.gmra.mxu1 %vm55_vm0, %v1378_v10  ;;  %488 = vmatpush.msra.mxu3 %v1541_v8 }
  0x17   :  { %443 = vmatpush.msra.mxu1 %v1510_v1 }
  0x1b   :  { %1405 = vmatmul.msk.f32.vlgmr.msrb.gmra.mxu0 %vm55_vm0, %v1377_v9 }
  0x1c   :  { %1407 = vmatmul.msk.f32.vlgmr.msrb.gmra.mxu2 %vm55_vm0, %v1379_v11  ;;  %1408 = vmatmul.msk.f32.vlgmr.msrb.gmra.mxu3 %vm55_vm0, %v1377_v9 }
  0x1d   :  { %550 = vmatpush.msrb.mxu2 %v1510_v1  ;;  %510 = vmatpush.msrb.mxu0 %v1505_v0 }
  0x1e   :  { %1406 = vmatmul.msk.f32.vlgmr.msrb.gmra.mxu1 %vm55_vm0, %v1378_v10  ;;  %571 = vmatpush.msrb.mxu3 %v1515_v2 }
  0x1f   :  { %530 = vmatpush.msrb.mxu1 %v1533_v6 }
  0x23   :  { %1409 = vmatmul.msk.f32.vlgmr.msra.gmra.mxu0 %vm55_vm0, %v1376_v5 }
  0x24   :  { %1411 = vmatmul.msk.f32.vlgmr.msra.gmra.mxu2 %vm55_vm0, %v1379_v11  ;;  %1412 = vmatmul.msk.f32.vlgmr.msra.gmra.mxu3 %vm55_vm0, %v1380_v12 }
  0x25   :  { %637 = vmatpush.msra.mxu2 %v1533_v6  ;;  %595 = vmatpush.msra.mxu0 %v1541_v8 }
  0x26   :  { %1410 = vmatmul.msk.f32.vlgmr.msra.gmra.mxu1 %vm55_vm0, %v1378_v10  ;;  %657 = vmatpush.msra.mxu3 %v1510_v1 }
  0x27   :  { %617 = vmatpush.msra.mxu1 %v1505_v0 }
  0x2b   :  { %1413 = vmatmul.msk.f32.vlgmr.msrb.gmra.mxu0 %vm55_vm0, %v1378_v10 }
  0x2c   :  { %1415 = vmatmul.msk.f32.vlgmr.msrb.gmra.mxu2 %vm55_vm0, %v1379_v11  ;;  %1416 = vmatmul.msk.f32.vlgmr.msrb.gmra.mxu3 %vm55_vm0, %v1380_v12 }
  0x2d   :  { %724 = vmatpush.msrb.mxu2 %v1505_v0  ;;  %678 = vmatpush.msrb.mxu0 %v1515_v2 }
  0x2e   :  { %1414 = vmatmul.msk.f32.vlgmr.msrb.gmra.mxu1 %vm55_vm0, %v1377_v9  ;;  %744 = vmatpush.msrb.mxu3 %v1533_v6 }
  0x2f   :  { %702 = vmatpush.msrb.mxu1 %v1541_v8 }
  0x33   :  { %1417 = vmatmul.msk.f32.vlgmr.msra.gmra.mxu0 %vm55_vm0, %v1381_v13 }
  0x34   :  { %1419 = vmatmul.msk.f32.vlgmr.msra.gmra.mxu2 %vm55_vm0, %v1378_v10  ;;  %1420 = vmatmul.msk.f32.vlgmr.msra.gmra.mxu3 %vm55_vm0, %v1380_v12 }
  0x35   :  { %809 = vmatpush.msra.mxu2 %v1541_v8  ;;  %764 = vmatpush.msra.mxu0 %v1510_v1 }
  0x36   :  { %1418 = vmatmul.msk.f32.vlgmr.msra.gmra.mxu1 %vm55_vm0, %v1379_v11  ;;  %831 = vmatpush.msra.mxu3 %v1505_v0 }
  0x37   :  { %785 = vmatpush.msra.mxu1 %v1515_v2 }
  0x3b   :  { %1421 = vmatmul.msk.f32.vlgmr.msrb.gmra.mxu0 %vm55_vm0, %v1381_v13 }
  0x3c   :  { %1423 = vmatmul.msk.f32.vlgmr.msrb.gmra.mxu2 %vm55_vm0, %v1380_v12  ;;  %1424 = vmatmul.msk.f32.vlgmr.msrb.gmra.mxu3 %vm55_vm0, %v1379_v11 }
  0x3d   :  { %892 = vmatpush.msrb.mxu2 %v1515_v2  ;;  %851 = vmatpush.msrb.mxu0 %v1533_v6 }
  0x3e   :  { %1422 = vmatmul.msk.f32.vlgmr.msrb.gmra.mxu1 %vm55_vm0, %v1382_v14  ;;  %916 = vmatpush.msrb.mxu3 %v1541_v8 }
  0x3f   :  { %871 = vmatpush.msrb.mxu1 %v1510_v1 }
  0x43   :  { %1425 = vmatmul.msk.f32.vlgmr.msra.gmra.mxu0 %vm55_vm0, %v1381_v13 }
  0x44   :  { %1427 = vmatmul.msk.f32.vlgmr.msra.gmra.mxu2 %vm55_vm0, %v1383_v15  ;;  %1428 = vmatmul.msk.f32.vlgmr.msra.gmra.mxu3 %vm55_vm0, %v1381_v13 }
  0x45   :  { %978 = vmatpush.msra.mxu2 %v1510_v1  ;;  %938 = vmatpush.msra.mxu0 %v1505_v0 }
  0x46   :  { %1426 = vmatmul.msk.f32.vlgmr.msra.gmra.mxu1 %vm55_vm0, %v1382_v14  ;;  %999 = vmatpush.msra.mxu3 %v1515_v2 }
  0x47   :  { %958 = vmatpush.msra.mxu1 %v1533_v6 }
  0x4b   :  { %1429 = vmatmul.msk.f32.vlgmr.msrb.gmra.mxu0 %vm55_vm0, %v1380_v12 }
  0x4c   :  { %1431 = vmatmul.msk.f32.vlgmr.msrb.gmra.mxu2 %vm55_vm0, %v1383_v15  ;;  %1432 = vmatmul.msk.f32.vlgmr.msrb.gmra.mxu3 %vm55_vm0, %v1384_v16 }
  0x4d   :  { %1065 = vmatpush.msrb.mxu2 %v1533_v6  ;;  %1023 = vmatpush.msrb.mxu0 %v1541_v8 }
  0x4e   :  { %1430 = vmatmul.msk.f32.vlgmr.msrb.gmra.mxu1 %vm55_vm0, %v1382_v14  ;;  %1085 = vmatpush.msrb.mxu3 %v1510_v1 }
  0x4f   :  { %1045 = vmatpush.msrb.mxu1 %v1505_v0 }
  0x53   :  { %1433 = vmatmul.msk.f32.vlgmr.msra.gmra.mxu0 %vm55_vm0, %v1382_v14 }
  0x54   :  { %1435 = vmatmul.msk.f32.vlgmr.msra.gmra.mxu2 %vm55_vm0, %v1383_v15  ;;  %1436 = vmatmul.msk.f32.vlgmr.msra.gmra.mxu3 %vm55_vm0, %v1384_v16 }
  0x55   :  { %1152 = vmatpush.msra.mxu2 %v1505_v0  ;;  %1106 = vmatpush.msra.mxu0 %v1515_v2 }
  0x56   :  { %1434 = vmatmul.msk.f32.vlgmr.msra.gmra.mxu1 %vm55_vm0, %v1381_v13  ;;  %1172 = vmatpush.msra.mxu3 %v1533_v6 }
  0x57   :  { %1130 = vmatpush.msra.mxu1 %v1541_v8 }
  0x5b   :  { %1437 = vmatmul.msk.f32.vlgmr.msrb.gmra.mxu0 %vm55_vm0, %v1385_v17 }
  0x5c   :  { %1439 = vmatmul.msk.f32.vlgmr.msrb.gmra.mxu2 %vm55_vm0, %v1382_v14  ;;  %1440 = vmatmul.msk.f32.vlgmr.msrb.gmra.mxu3 %vm55_vm0, %v1384_v16 }
  0x5d   :  { %1237 = vmatpush.msrb.mxu2 %v1541_v8  ;;  %1192 = vmatpush.msrb.mxu0 %v1510_v1 }
  0x5e   :  { %1438 = vmatmul.msk.f32.vlgmr.msrb.gmra.mxu1 %vm55_vm0, %v1383_v15  ;;  %1259 = vmatpush.msrb.mxu3 %v1505_v0 }
  0x5f   :  { %1213 = vmatpush.msrb.mxu1 %v1515_v2 }
  0x63   :  { %1441 = vmatmul.msk.f32.vlgmr.msra.gmra.mxu0 %vm55_vm0, %v1385_v17 }
  0x64   :  { %1443 = vmatmul.msk.f32.vlgmr.msra.gmra.mxu2 %vm55_vm0, %v1384_v16  ;;  %1444 = vmatmul.msk.f32.vlgmr.msra.gmra.mxu3 %vm55_vm0, %v1383_v15 }
  0x65   :  { %1320 = vmatpush.msra.mxu2 %v1515_v2  ;;  %1279 = vmatpush.msra.mxu0 %v1533_v6 }
  0x66   :  { %1442 = vmatmul.msk.f32.vlgmr.msra.gmra.mxu1 %vm55_vm0, %v1386_v18  ;;  %1344 = vmatpush.msra.mxu3 %v1541_v8 }
  0x67   :  { %1299 = vmatpush.msra.mxu1 %v1510_v1 }
  0x6b   :  { %1445 = vmatmul.msk.f32.vlgmr.msrb.gmra.mxu0 %vm55_vm0, %v1385_v17 }
  0x6c   :  { %1447 = vmatmul.msk.f32.vlgmr.msrb.gmra.mxu2 %vm55_vm0, %v1387_v19  ;;  %1448 = vmatmul.msk.f32.vlgmr.msrb.gmra.mxu3 %vm55_vm0, %v1385_v17 }
  0x6e   :  { %1446 = vmatmul.msk.f32.vlgmr.msrb.gmra.mxu1 %vm55_vm0, %v1386_v18 }
  0x73   :  { %1449 = vmatmul.msk.f32.vlgmr.msra.gmra.mxu0 %vm55_vm0, %v1384_v16 }
  0x74   :  { %1451 = vmatmul.msk.f32.vlgmr.msra.gmra.mxu2 %vm55_vm0, %v1387_v19  ;;  %1452 = vmatmul.msk.f32.vlgmr.msra.gmra.mxu3 %vm55_vm0, %v1388_v20 }
  0x76   :  { %1450 = vmatmul.msk.f32.vlgmr.msra.gmra.mxu1 %vm55_vm0, %v1386_v18 }
  0x80   :  { %v76_v21 = vpop.f32.mrf.mxu0 }
  0x83   :  { %v99_v22 = vpop.f32.mrf.mxu1 }
  0x84   :  { %v100_v23 = vadd.f32 %v99_v22, %v76_v21 }
  0x87   :  { %v122_v24 = vpop.f32.mrf.mxu2  ;;  %v146_v25 = vpop.f32.mrf.mxu3 }
  0x88   :  { %v125_v26 = vadd.f32 %v122_v24, %v100_v23  ;;  %v170_v27 = vpop.f32.mrf.mxu0 }
  0x8a   :  { %v149_v28 = vadd.f32 %v146_v25, %v125_v26 }
  0x8b   :  { %v191_v29 = vpop.f32.mrf.mxu1 }
  0x8c   :  { %v173_v30 = vadd.f32 %v170_v27, %v149_v28 }
  0x8f   :  { %v211_v31 = vpop.f32.mrf.mxu2  ;;  %v231_v32 = vpop.f32.mrf.mxu3 }
  0x90   :  { %v212_v33 = vadd.f32 %v211_v31, %v191_v29  ;;  %v252_v34 = vpop.f32.mrf.mxu0 }
  0x92   :  { %v234_v35 = vadd.f32 %v231_v32, %v212_v33 }
  0x93   :  { %v276_v36 = vpop.f32.mrf.mxu1 }
  0x94   :  { %v255_v37 = vadd.f32 %v252_v34, %v234_v35 }
  0x96   :  { %v279_v38 = vadd.f32 %v276_v36, %v255_v37 }
  0x97   :  { %v298_v39 = vpop.f32.mrf.mxu2  ;;  %v318_v40 = vpop.f32.mrf.mxu3 }
  0x98   :  { %v280_v41 = vmax.f32 %v173_v30, %v279_v38  ;;  %v319_v42 = vadd.f32 %v318_v40, %v298_v39  ;;  %v338_v43 = vpop.f32.mrf.mxu0 }
  0x9a   :  { %v341_v44 = vadd.f32 %v338_v43, %v319_v42 }
  0x9b   :  { %v359_v45 = vpop.f32.mrf.mxu1 }
  0x9c   :  { %v362_v46 = vadd.f32 %v359_v45, %v341_v44 }
  0x9f   :  { %v383_v47 = vpop.f32.mrf.mxu2  ;;  %v405_v48 = vpop.f32.mrf.mxu3 }
  0xa0   :  { %v386_v49 = vadd.f32 %v383_v47, %v362_v46  ;;  %v425_v50 = vpop.f32.mrf.mxu0 }
  0xa1   :  { %v426_v51 = vadd.f32 %v425_v50, %v405_v48 }
  0xa2   :  { %v387_v52 = vmax.f32 %v280_v41, %v386_v49 }
  0xa3   :  { %v445_v53 = vpop.f32.mrf.mxu1 }
  0xa4   :  { %v448_v54 = vadd.f32 %v445_v53, %v426_v51 }
  0xa7   :  { %v466_v55 = vpop.f32.mrf.mxu2  ;;  %v490_v56 = vpop.f32.mrf.mxu3 }
  0xa8   :  { %v469_v57 = vadd.f32 %v466_v55, %v448_v54  ;;  %v512_v58 = vpop.f32.mrf.mxu0 }
  0xaa   :  { %v493_v59 = vadd.f32 %v490_v56, %v469_v57 }
  0xab   :  { %v532_v60 = vpop.f32.mrf.mxu1 }
  0xac   :  { %v494_v61 = vmax.f32 %v387_v52, %v493_v59  ;;  %v533_v25 = vadd.f32 %v532_v60, %v512_v58 }
  0xaf   :  { %v552_v62 = vpop.f32.mrf.mxu2  ;;  %v573_v63 = vpop.f32.mrf.mxu3 }
  0xb0   :  { %v597_v0 = vpop.f32.mrf.mxu0  ;;  %v555_v27 = vadd.f32 %v552_v62, %v533_v25 }
  0xb2   :  { %v576_v31 = vadd.f32 %v573_v63, %v555_v27 }
  0xb3   :  { %v619_v1 = vpop.f32.mrf.mxu1 }
  0xb4   :  { %v600_v40 = vadd.f32 %v597_v0, %v576_v31 }
  0xb6   :  { %v601_v49 = vmax.f32 %v494_v61, %v600_v40 }
  0xb7   :  { %v639_v2 = vpop.f32.mrf.mxu2  ;;  %v659_v3 = vpop.f32.mrf.mxu3 }
  0xb8   :  { %v680_v4 = vpop.f32.mrf.mxu0  ;;  %v640_v22 = vadd.f32 %v639_v2, %v619_v1 }
  0xba   :  { %v662_v28 = vadd.f32 %v659_v3, %v640_v22 }
  0xbb   :  { %v704_v5 = vpop.f32.mrf.mxu1 }
  0xbc   :  { %v683_v33 = vadd.f32 %v680_v4, %v662_v28 }
  0xbe   :  { %v707_v43 = vadd.f32 %v704_v5, %v683_v33 }
  0xbf   :  { %v726_v6 = vpop.f32.mrf.mxu2  ;;  %v746_v7 = vpop.f32.mrf.mxu3 }
  0xc0   :  { %v766_v8 = vpop.f32.mrf.mxu0  ;;  %v747_v30 = vadd.f32 %v746_v7, %v726_v6  ;;  %v708_v54 = vmax.f32 %v601_v49, %v707_v43 }
  0xc2   :  { %v769_v36 = vadd.f32 %v766_v8, %v747_v30 }
  0xc3   :  { %v787_v9 = vpop.f32.mrf.mxu1 }
  0xc4   :  { %v790_v45 = vadd.f32 %v787_v9, %v769_v36 }
  0xc7   :  { %v811_v10 = vpop.f32.mrf.mxu2  ;;  %v833_v11 = vpop.f32.mrf.mxu3 }
  0xc8   :  { %v853_v12 = vpop.f32.mrf.mxu0  ;;  %v814_v50 = vadd.f32 %v811_v10, %v790_v45 }
  0xc9   :  { %v854_v32 = vadd.f32 %v853_v12, %v833_v11  ;;  %v1454_v11 = vld [vmem:[%s1703_s2] ss:$0 sm:$0xff] }
  0xca   :  { %v815_v59 = vmax.f32 %v708_v54, %v814_v50 }
  0xcb   :  { %v873_v13 = vpop.f32.mrf.mxu1 }
  0xcc   :  { %v876_v41 = vadd.f32 %v873_v13, %v854_v32 }
  0xcf   :  { %v894_v14 = vpop.f32.mrf.mxu2  ;;  %v918_v15 = vpop.f32.mrf.mxu3 }
  0xd0   :  { %v940_v16 = vpop.f32.mrf.mxu0  ;;  %v897_v46 = vadd.f32 %v894_v14, %v876_v41 }
  0xd2   :  { %v921_v55 = vadd.f32 %v918_v15, %v897_v46 }
  0xd3   :  { %v960_v17 = vpop.f32.mrf.mxu1 }
  0xd4   :  { %v961_v37 = vadd.f32 %v960_v17, %v940_v16  ;;  %v922_v0 = vmax.f32 %v815_v59, %v921_v55 }
  0xd7   :  { %v980_v18 = vpop.f32.mrf.mxu2  ;;  %v1001_v19 = vpop.f32.mrf.mxu3 }
  0xd8   :  { %v1025_v20 = vpop.f32.mrf.mxu0  ;;  %v983_v42 = vadd.f32 %v980_v18, %v961_v37 }
  0xda   :  { %v1004_v51 = vadd.f32 %v1001_v19, %v983_v42 }
  0xdb   :  { %v1047_v21 = vpop.f32.mrf.mxu1 }
  0xdc   :  { %v1028_v60 = vadd.f32 %v1025_v20, %v1004_v51 }
  0xde   :  { %v1029_v3 = vmax.f32 %v922_v0, %v1028_v60 }
  0xdf   :  { %v1067_v23 = vpop.f32.mrf.mxu2  ;;  %v1087_v24 = vpop.f32.mrf.mxu3 }
  0xe0   :  { %v1108_v26 = vpop.f32.mrf.mxu0  ;;  %v1068_v38 = vadd.f32 %v1067_v23, %v1047_v21 }
  0xe2   :  { %v1090_v47 = vadd.f32 %v1087_v24, %v1068_v38 }
  0xe3   :  { %v1132_v29 = vpop.f32.mrf.mxu1 }
  0xe4   :  { %v1111_v56 = vadd.f32 %v1108_v26, %v1090_v47 }
  0xe6   :  { %v1135_v1 = vadd.f32 %v1132_v29, %v1111_v56 }
  0xe7   :  { %v1154_v34 = vpop.f32.mrf.mxu2  ;;  %v1174_v35 = vpop.f32.mrf.mxu3 }
  0xe8   :  { %v1194_v39 = vpop.f32.mrf.mxu0  ;;  %v1175_v48 = vadd.f32 %v1174_v35, %v1154_v34  ;;  %v1136_v7 = vmax.f32 %v1029_v3, %v1135_v1 }
  0xea   :  { %v1197_v57 = vadd.f32 %v1194_v39, %v1175_v48 }
  0xeb   :  { %v1215_v44 = vpop.f32.mrf.mxu1 }
  0xec   :  { %v1218_v2 = vadd.f32 %v1215_v44, %v1197_v57 }
  0xef   :  { %v1239_v52 = vpop.f32.mrf.mxu2  ;;  %v1261_v53 = vpop.f32.mrf.mxu3 }
  0xf0   :  { %v1281_v58 = vpop.f32.mrf.mxu0  ;;  %v1242_v4 = vadd.f32 %v1239_v52, %v1218_v2 }
  0xf1   :  { %v1282_v62 = vadd.f32 %v1281_v58, %v1261_v53 }
  0xf2   :  { %v1243_v9 = vmax.f32 %v1136_v7, %v1242_v4 }
  0xf3   :  { %v1301_v63 = vpop.f32.mrf.mxu1 }
  0xf4   :  { %v1304_v5 = vadd.f32 %v1301_v63, %v1282_v62 }
  0xf7   :  { %v1322_v61 = vpop.f32.mrf.mxu2  ;;  %v1346_v6 = vpop.f32.mrf.mxu3 }
  0xf8   :  { %v1325_v8 = vadd.f32 %v1322_v61, %v1304_v5 }
  0xfa   :  { %v1349_v10 = vadd.f32 %v1346_v6, %v1325_v8 }
  0xfc   :  { %v1350_v12 = vmax.f32 %v1243_v9, %v1349_v10 }
  0xfe   :  { %v1355_v13 = vadd.f32 %v1454_v11, %v1350_v12 }
 0x100   :  { %v1356_v14 = vmax.f32 %v1355_v13, 0.0 }
 0x102   :  { %1357 = vst [vmem:[#allocation2] sm:$0xff] %v1356_v14 }
 0x103   :  { %1368 = dma.vmem_to_hbm [thread:$0]  %s1364_s28, 128, %s1366_s1, [#allocation3]  }
 0x104   :  { %1479 = dma.done.wait [#allocation3], 128  }
 0x105   :  { %1480 = vsyncadd [#allocation3], 4294967168 }
 0x106   :  { %1373 = vsyncpa [#allocation3], 1 }

</bundles_post_ra>
